<compile_context>
chip_gen: v7x
topology: tpu7x:2x2x1
jax: 0.10.0
libtpu: 0.0.40
codegen_flags: <defaults>
</compile_context>

<pallas_src>
import functools

import jax
import jax.numpy as jnp
from jax.experimental import pallas as pl
from jax.experimental.pallas import tpu as pltpu


def _irisnet_kernel(x_ref, w1_ref, w2_ref, w3_ref, o_ref, *, use_sigmoid: bool):
    """One batch tile of the fused forward pass.

    x_ref :  [TB, 4]       f32   native layout (batch on sublanes, feats on lanes)
    w1_ref:  [m0, 5]       bf16  fc1 weight with b1 folded in as last column
    w2_ref:  [m1, m0 + 1]  bf16  fc2 weight with b2 folded in as last column
    w3_ref:  [3,  m1 + 1]  bf16  fc3 weight with b3 folded in as last column
    o_ref :  [3,  TB]      f32   class probabilities (lane-dense store)
    """
    act = jax.nn.sigmoid if use_sigmoid else (lambda v: jnp.maximum(v, 0.0))
    tb = x_ref.shape[0]

    ones_col = jnp.ones((tb, 1), jnp.float32)   # the "bias feature" for fc1
    ones_row = jnp.ones((1, tb), jnp.float32)   # the "bias feature" for fc2/fc3

    # fc1: contract dim 1 of both operands (transposed-RHS MXU matmul) -> [m0, TB]
    x_aug = jnp.concatenate([x_ref[...], ones_col], axis=1).astype(jnp.bfloat16)
    h1 = jax.lax.dot_general(
        w1_ref[...], x_aug, (((1,), (1,)), ((), ())),
        preferred_element_type=jnp.float32)                                # [m0, TB]

    # fc2 (bias via ones row on the sublane axis)
    z1 = jnp.concatenate([act(h1), ones_row], axis=0).astype(jnp.bfloat16)  # [m0+1, TB]
    h2 = jnp.dot(w2_ref[...], z1, preferred_element_type=jnp.float32)       # [m1, TB]

    # fc3
    z2 = jnp.concatenate([act(h2), ones_row], axis=0).astype(jnp.bfloat16)  # [m1+1, TB]
    h3 = jnp.dot(w3_ref[...], z2, preferred_element_type=jnp.float32)       # [3, TB]

    # softmax over the 3 classes (sublane axis): explicit 3-term max/sum stays on
    # the VPU (no XLU reduce); exact reciprocal on the otherwise-idle EUP.
    m = jnp.maximum(jnp.maximum(h3[0:1, :], h3[1:2, :]), h3[2:3, :])        # [1, TB]
    e = jnp.exp(h3 - m)                                                     # [3, TB]
    s = e[0:1, :] + e[1:2, :] + e[2:3, :]                                   # [1, TB]
    o_ref[...] = (e * pl.reciprocal(s, approx=False)).astype(o_ref.dtype)


def pack_params(params):
    """One-time packing: fold each bias into its weight as an extra bf16 column."""
    def fold(w, b):
        return jnp.concatenate([w, b[:, None]], axis=1).astype(jnp.bfloat16)
    return {"w1": fold(params["w1"], params["b1"]),
            "w2": fold(params["w2"], params["b2"]),
            "w3": fold(params["w3"], params["b3"])}


def irisnet_forward_t(x, packed, *, use_sigmoid: bool = False, batch_tile=None):
    """x: [B, 4] f32 -> probabilities in lane-dense [3, B] layout (no output transpose)."""
    B = x.shape[0]
    m0 = packed["w1"].shape[0]
    m1 = packed["w2"].shape[0]
    assert packed["w1"].shape == (m0, 5)
    assert packed["w2"].shape == (m1, m0 + 1)
    assert packed["w3"].shape == (3, m1 + 1)

    if batch_tile is None:
        # 1-2 grid steps total (overhead-bound kernel), but keep 2 "parallel"
        # steps when B > 128 so v7x megacore can shard the batch axis.
        half = -(-B // 2)
        batch_tile = max(128, -(-half // 128) * 128)
    assert batch_tile % 128 == 0, "batch tile must be a multiple of the 128 lanes"

    num_tiles = pl.cdiv(B, batch_tile)
    b_pad = num_tiles * batch_tile
    if b_pad != B:  # only for tile-unaligned B; garbage columns are sliced off below
        x = jnp.pad(x, ((0, b_pad - B), (0, 0)))

    kernel = functools.partial(_irisnet_kernel, use_sigmoid=use_sigmoid)

    def resident(a):  # same block index every grid step -> DMA'd once, VMEM-resident
        return pl.BlockSpec(a.shape, lambda i: (0, 0))

    out_t = pl.pallas_call(
        kernel,
        out_shape=jax.ShapeDtypeStruct((3, b_pad), jnp.float32),
        grid=(num_tiles,),
        in_specs=[
            pl.BlockSpec((batch_tile, 4), lambda i: (i, 0)),      # pipelined x tile
            resident(packed["w1"]), resident(packed["w2"]), resident(packed["w3"]),
        ],
        out_specs=pl.BlockSpec((3, batch_tile), lambda i: (0, i)),  # lane-dense store
        compiler_params=pltpu.CompilerParams(
            dimension_semantics=("parallel",)),                     # megacore on v7x
    )(x, packed["w1"], packed["w2"], packed["w3"])

    return out_t[:, :B] if b_pad != B else out_t


def irisnet_forward(x, packed, *, use_sigmoid: bool = False, batch_tile=None):
    """Module-semantics API: [B, 4] -> [B, 3].  The only remaining boundary op is
    this final transpose; use irisnet_forward_t if the caller can consume [3, B]."""
    return irisnet_forward_t(x, packed, use_sigmoid=use_sigmoid,
                             batch_tile=batch_tile).T


def init_params(key, middle_layer=(32, 16)):
    """PyTorch nn.Linear-style init: W [out, in], b [out], U(+-1/sqrt(fan_in))."""
    m0, m1 = middle_layer
    dims = [(4, m0), (m0, m1), (m1, 3)]
    params = {}
    for i, (fan_in, fan_out) in enumerate(dims, start=1):
        key, kw, kb = jax.random.split(key, 3)
        bound = 1.0 / jnp.sqrt(fan_in)
        params[f"w{i}"] = jax.random.uniform(
            kw, (fan_out, fan_in), jnp.float32, -bound, bound)
        params[f"b{i}"] = jax.random.uniform(
            kb, (fan_out,), jnp.float32, -bound, bound)
    return params


def irisnet_reference_f32(x, params, *, use_sigmoid: bool = False):
    """Pure-f32 reference of the PyTorch module semantics."""
    act = jax.nn.sigmoid if use_sigmoid else jax.nn.relu
    h1 = x @ params["w1"].T + params["b1"]
    h2 = act(h1) @ params["w2"].T + params["b2"]
    h3 = act(h2) @ params["w3"].T + params["b3"]
    return jax.nn.softmax(h3, axis=1)


def irisnet_reference_bf16(x, params, *, use_sigmoid: bool = False):
    """Reference matching the kernel's numeric path (bf16 MXU operands + bf16 bias, f32 acc)."""
    act = jax.nn.sigmoid if use_sigmoid else jax.nn.relu

    def layer(a, w, b):
        y = jnp.dot(a.astype(jnp.bfloat16), w.astype(jnp.bfloat16).T,
                    preferred_element_type=jnp.float32)
        return y + b.astype(jnp.bfloat16).astype(jnp.float32)

    h1 = layer(x, params["w1"], params["b1"])
    h2 = layer(act(h1), params["w2"], params["b2"])
    h3 = layer(act(h2), params["w3"], params["b3"])
    return jax.nn.softmax(h3, axis=1)


if __name__ == "__main__":
    key = jax.random.PRNGKey(0)
    key, kx = jax.random.split(key)

    middle_layer = (32, 16)   # hidden sizes; Iris input dim is 4, output dim is 3
    B = 256                   # tile-aligned small demo batch: no pad, 2 parallel grid steps

    x = jax.random.normal(kx, (B, 4), jnp.float32)
    params = init_params(key, middle_layer)
    packed = pack_params(params)          # one-time weight/bias folding (outside hot path)

    fwd = jax.jit(functools.partial(irisnet_forward, use_sigmoid=False))
    y = jax.block_until_ready(fwd(x, packed))

    assert y.shape == (B, 3)
    # exact reciprocal softmax: rows sum to 1 within f32 rounding
    assert bool(jnp.allclose(jnp.sum(y, axis=1), 1.0, atol=1e-4))
    # tight check against a reference matching the kernel's bf16/f32 numeric path
    y_bf16 = irisnet_reference_bf16(x, params, use_sigmoid=False)
    assert bool(jnp.allclose(y, y_bf16, atol=5e-3)), float(jnp.max(jnp.abs(y - y_bf16)))
    # looser check against the pure-f32 module semantics
    y_f32 = irisnet_reference_f32(x, params, use_sigmoid=False)
    assert bool(jnp.allclose(y, y_f32, atol=2e-2)), float(jnp.max(jnp.abs(y - y_f32)))

    print("KERNEL_OK")
</pallas_src>

<mosaic_0001>
module attributes {stable_mosaic.version = 11 : i64} {
  func.func @_irisnet_kernel(%arg0: i32, %arg1: memref<128x4xf32, #tpu.memory_space<vmem>>, %arg2: memref<32x5xbf16, #tpu.memory_space<vmem>>, %arg3: memref<16x33xbf16, #tpu.memory_space<vmem>>, %arg4: memref<3x17xbf16, #tpu.memory_space<vmem>>, %arg5: memref<3x128xf32, #tpu.memory_space<vmem>>) attributes {dimension_semantics = [#tpu.dimension_semantics<parallel>], iteration_bounds = array<i64: 2>, scalar_prefetch = 0 : i64, scratch_operands = 0 : i64, tpu.core_type = #tpu.core_type<tc>, window_params = [{transform_indices = @transform_0, window_bounds = array<i64: 128, 4>}, {pipeline_mode = #tpu.pipeline_mode<synchronous>, transform_indices = @transform_1, window_bounds = array<i64: 32, 5>}, {pipeline_mode = #tpu.pipeline_mode<synchronous>, transform_indices = @transform_2, window_bounds = array<i64: 16, 33>}, {pipeline_mode = #tpu.pipeline_mode<synchronous>, transform_indices = @transform_3, window_bounds = array<i64: 3, 17>}, {transform_indices = @transform_4, window_bounds = array<i64: 3, 128>}]} {
    %cst = arith.constant 1.000000e+00 : f32
    %0 = vector.broadcast %cst : f32 to vector<128x1xf32>
    %cst_0 = arith.constant 1.000000e+00 : f32
    %1 = vector.broadcast %cst_0 : f32 to vector<1x128xf32>
    %c0 = arith.constant 0 : index
    %c0_1 = arith.constant 0 : index
    %2 = vector.load %arg1[%c0, %c0_1] : memref<128x4xf32, #tpu.memory_space<vmem>>, vector<128x4xf32>
    %3 = tpu.concatenate %2, %0 in 1 : vector<128x4xf32>, vector<128x1xf32> -> vector<128x5xf32>
    %4 = arith.truncf %3 : vector<128x5xf32> to vector<128x5xbf16>
    %c0_2 = arith.constant 0 : index
    %c0_3 = arith.constant 0 : index
    %5 = vector.load %arg2[%c0_2, %c0_3] : memref<32x5xbf16, #tpu.memory_space<vmem>>, vector<32x5xbf16>
    %cst_4 = arith.constant dense<0.000000e+00> : vector<32x128xf32>
    %6 = tpu.matmul %5, %4, %cst_4 {dimension_numbers = #tpu.dot_dimension_numbers<[1], [1], [0], [0], [0, 0, 1, 0], [], []>} : vector<32x5xbf16>, vector<128x5xbf16>, vector<32x128xf32> -> vector<32x128xf32>
    %cst_5 = arith.constant 0.000000e+00 : f32
    %7 = vector.broadcast %cst_5 : f32 to vector<32x128xf32>
    %8 = arith.maximumf %6, %7 : vector<32x128xf32>
    %9 = tpu.concatenate %8, %1 in 0 : vector<32x128xf32>, vector<1x128xf32> -> vector<33x128xf32>
    %10 = arith.truncf %9 : vector<33x128xf32> to vector<33x128xbf16>
    %c0_6 = arith.constant 0 : index
    %c0_7 = arith.constant 0 : index
    %11 = vector.load %arg3[%c0_6, %c0_7] : memref<16x33xbf16, #tpu.memory_space<vmem>>, vector<16x33xbf16>
    %cst_8 = arith.constant dense<0.000000e+00> : vector<16x128xf32>
    %12 = tpu.matmul %11, %10, %cst_8 {dimension_numbers = #tpu.dot_dimension_numbers<[1], [0], [0], [1], [0, 0, 1, 1], [], []>} : vector<16x33xbf16>, vector<33x128xbf16>, vector<16x128xf32> -> vector<16x128xf32>
    %cst_9 = arith.constant 0.000000e+00 : f32
    %13 = vector.broadcast %cst_9 : f32 to vector<16x128xf32>
    %14 = arith.maximumf %12, %13 : vector<16x128xf32>
    %15 = tpu.concatenate %14, %1 in 0 : vector<16x128xf32>, vector<1x128xf32> -> vector<17x128xf32>
    %16 = arith.truncf %15 : vector<17x128xf32> to vector<17x128xbf16>
    %c0_10 = arith.constant 0 : index
    %c0_11 = arith.constant 0 : index
    %17 = vector.load %arg4[%c0_10, %c0_11] : memref<3x17xbf16, #tpu.memory_space<vmem>>, vector<3x17xbf16>
    %cst_12 = arith.constant dense<0.000000e+00> : vector<3x128xf32>
    %18 = tpu.matmul %17, %16, %cst_12 {dimension_numbers = #tpu.dot_dimension_numbers<[1], [0], [0], [1], [0, 0, 1, 1], [], []>} : vector<3x17xbf16>, vector<17x128xbf16>, vector<3x128xf32> -> vector<3x128xf32>
    %19 = vector.extract_strided_slice %18 {offsets = [0, 0], sizes = [1, 128], strides = [1, 1]} : vector<3x128xf32> to vector<1x128xf32>
    %20 = vector.extract_strided_slice %18 {offsets = [1, 0], sizes = [1, 128], strides = [1, 1]} : vector<3x128xf32> to vector<1x128xf32>
    %21 = arith.maximumf %19, %20 : vector<1x128xf32>
    %22 = vector.extract_strided_slice %18 {offsets = [2, 0], sizes = [1, 128], strides = [1, 1]} : vector<3x128xf32> to vector<1x128xf32>
    %23 = arith.maximumf %21, %22 : vector<1x128xf32>
    %24 = vector.broadcast %23 : vector<1x128xf32> to vector<3x128xf32>
    %25 = arith.subf %18, %24 : vector<3x128xf32>
    %26 = math.exp %25 : vector<3x128xf32>
    %27 = vector.extract_strided_slice %26 {offsets = [0, 0], sizes = [1, 128], strides = [1, 1]} : vector<3x128xf32> to vector<1x128xf32>
    %28 = vector.extract_strided_slice %26 {offsets = [1, 0], sizes = [1, 128], strides = [1, 1]} : vector<3x128xf32> to vector<1x128xf32>
    %29 = arith.addf %27, %28 : vector<1x128xf32>
    %30 = vector.extract_strided_slice %26 {offsets = [2, 0], sizes = [1, 128], strides = [1, 1]} : vector<3x128xf32> to vector<1x128xf32>
    %31 = arith.addf %29, %30 : vector<1x128xf32>
    %32 = tpu.reciprocal %31 : vector<1x128xf32> -> vector<1x128xf32>
    %33 = vector.broadcast %32 : vector<1x128xf32> to vector<3x128xf32>
    %34 = arith.mulf %26, %33 : vector<3x128xf32>
    %c0_13 = arith.constant 0 : index
    %c0_14 = arith.constant 0 : index
    %35 = vector.load %arg5[%c0_13, %c0_14] : memref<3x128xf32, #tpu.memory_space<vmem>>, vector<3x128xf32>
    tpu.vector_store %arg5[%c0_13, %c0_14], %34 {strides = array<i32>} : memref<3x128xf32, #tpu.memory_space<vmem>>, vector<3x128xf32>,
    return
  }
  func.func @transform_0(%arg0: i32) -> (i32, i32) {
    %c0_i32 = arith.constant 0 : i32
    %c0_i32_0 = arith.constant 0 : i32
    return %arg0, %c0_i32 : i32, i32
  }
  func.func @transform_1(%arg0: i32) -> (i32, i32) {
    %c0_i32 = arith.constant 0 : i32
    %c0_i32_0 = arith.constant 0 : i32
    %c0_i32_1 = arith.constant 0 : i32
    return %c0_i32, %c0_i32_0 : i32, i32
  }
  func.func @transform_2(%arg0: i32) -> (i32, i32) {
    %c0_i32 = arith.constant 0 : i32
    %c0_i32_0 = arith.constant 0 : i32
    %c0_i32_1 = arith.constant 0 : i32
    return %c0_i32, %c0_i32_0 : i32, i32
  }
  func.func @transform_3(%arg0: i32) -> (i32, i32) {
    %c0_i32 = arith.constant 0 : i32
    %c0_i32_0 = arith.constant 0 : i32
    %c0_i32_1 = arith.constant 0 : i32
    return %c0_i32, %c0_i32_0 : i32, i32
  }
  func.func @transform_4(%arg0: i32) -> (i32, i32) {
    %c0_i32 = arith.constant 0 : i32
    %c0_i32_0 = arith.constant 0 : i32
    return %c0_i32, %arg0 : i32, i32
  }
}

</mosaic_0001>

<bundles_post_ra>
// kernel: irisnet_forward.1
= control target key start
LH: loop header
LB: loop body
LE: loop exit
PB: predicated region body
PF: predicated region fallthrough
CT: control target
= control target key end

     0   :  { %9 = vsyncpa [#allocation3], 0  ;;  %s936_s0 = inlined_call_operand.vmem [shape: f32[256,4], index: 0, kind: input, shape index: {}]   ;;  %s937_s1 = inlined_call_operand.vmem [shape: bf16[32,5], index: 1, kind: input, shape index: {}]   ;;  %s938_s2 = inlined_call_operand.vmem [shape: bf16[16,33], index: 2, kind: input, shape index: {}]   ;;  %s939_s3 = inlined_call_operand.vmem [shape: bf16[3,17], index: 3, kind: input, shape index: {}]   ;;  %s940_s4 = inlined_call_operand.hbm [shape: f32[3,256], index: 4, kind: output, shape index: {}]  }
   0x1   :  { %11 = vsyncpa [#allocation3 + $0x1], 0  ;;  %s771_s15 = smov 0   ;;  %s773_s16 = smov 0  }
   0x2   :  { %s775_s17 = smov 0   ;;  %s777_s18 = smov 0  }
   0x3 LB: > { %s792_s19 = sadd.s32 4294967295, %s740_s18   ;;  %s548_s20 = sadd.s32 4294967294, %s740_s18   ;;  %s740_s18 = sphi %s777_s18, %s946_s18   ;;  %s736_s17 = sphi %s775_s17, %s945_s17   ;;  %s732_s16 = sphi %s773_s16, %s944_s16   ;;  %s728_s15 = sphi %s771_s15, %s943_s15  }
   0x4   : > { %s796_s21 = sadd.s32 1, %s740_s18   ;;  %s113_s22 = sadd.s32 1, %s736_s17 }
   0x5   : > { %s110_s23 = ssub.s32 %s740_s18, %s796_s21  ;;  %p123_p0 = scmp.ne.s32.totalorder %s736_s17, %s732_s16 }
   0x6   : > { %p111_p1 = scmp.eq.s32.totalorder %s110_s23, 0  ;;  %p124_p2 = scmp.eq.s32.totalorder %s792_s19, 1 }
   0x7   : > { %p129_p3 = scmp.ne.s32.totalorder %s732_s16, %s728_s15  ;;  %p130_p4 = scmp.eq.s32.totalorder %s548_s20, 1 }
   0x8   : > { %s807_s24 = scalar_select %p111_p1, %s736_s17, %s113_s22  }
   0x9   : > { %p809_p5 = por %p124_p2, %p123_p0  ;;  %p813_p6 = por %p130_p4, %p129_p3 }
   0xa   : > { %p551_p7 = scmp.ge.s32.totalorder %s740_s18, 1  ;;  %p166_p8 = scmp.lt.s32.totalorder %s740_s18, 3 }
   0xc   : > { %p167_p9 = pnand %p551_p7, %p166_p8 }
   0xd   : > { %s553_s27 = sshll.u32 (!%p167_p9), %s792_s19, 4  ;;  %v671_v0 = vld [vmem:[%s937_s1] sm:$0xff] (!%p167_p9)   ;;  %vm254_vm0 = vcmask (!%p167_p9), 39936   ;;  %vm215_vm1 = vcmask (!%p167_p9), 31744   ;;  %v672_v49 = vld [vmem:[%s937_s1 + $0x8] sm:$0xff] (!%p167_p9)   ;;  %v742_v50 = vmov (!%p167_p9), 0.0  }
   0xe   : > { %170 = sbr.rel (%p167_p9) target bundleno = 817 (0x331), region = 36  ;;  %p193_p10 = scmp.lt.s32.totalorder (!%p167_p9), %s553_s27, 31  ;;  %599 = vmatprep.mubr.msk.bf16.mxu0 (!%p167_p9), %vm254_vm0, %v671_v0  ;;  %603 = vmatprep.subr.bf16.mxu1 (!%p167_p9), %v742_v50  ;;  %vm743_vm2 = vmmov (!%p167_p9), 0   ;;  %vm352_vm3 = vcmask (!%p167_p9), 1040384   ;;  %v744_v61 = vmov (!%p167_p9), 0   ;;  %v673_v0 = vld [vmem:[%s938_s2] sm:$0xff] (!%p167_p9)  }
   0xf   : > { %609 = vmatprep.mubr.msk.bf16.mxu1 (!%p167_p9), %vm743_vm2, %v742_v50  ;;  %v354_v62 = vsel (!%p167_p9), %vm352_vm3, 65535, %v744_v61  ;;  %vm348_vm4 = vcmask (!%p167_p9), 269312   ;;  %vm403_vm5 = vcmask (!%p167_p9), 138240   ;;  %s189_s14 = sand.u32 (!%p167_p9), 1, %s732_s16   ;;  %s563_s22 = sshll.u32 (!%p167_p9), %s792_s19, 6 }
  0x10   : > { %v356_v63 = vand.u32 (!%p167_p9), 1.0|1.0, %v354_v62  ;;  %s552_s20 = sshll.u32 (!%p167_p9), %s189_s14, 2  ;;  %s476_s5 = scalar_lea.sflag (!%p167_p9), [#allocation3], %s189_s14 }
  0x11   : > { %s191_s23 = scalar_lea.vmem (!%p167_p9), [#allocation2], %s552_s20  ;;  %s745_s19 = smov (!%p167_p9), [#allocation2]  }
  0x15   : > { %s948_s27 = smov (!%p193_p10, %s553_s27), 31 }
  0x16   : > { %s554_s30 = sshll.u32 %s948_s27, 3  ;;  %s489_s27 = sshll.u32 %s191_s23, 4  ;;  %s896_s27 = int_to_ptr.vmem [resolvable:$true] %s489_s27 }
  0x17   : > { %s827_s7 = scalar_lea.vmem %s936_s0, %s554_s30  ;;  %s894_s30 = scalar_lea.hbm %s940_s4, %s563_s22 }
  0x18   : > { %v199_v1 = vld [vmem:[%s827_s7] sm:$0xff]  ;;  %v200_v2 = vld [vmem:[%s827_s7 + $0x8] sm:$0xff]  ;;  %v201_v3 = vld [vmem:[%s827_s7 + $0x10] sm:$0xff]  ;;  %s678_s6 = scalar_lea.vmem %s896_s27, 64 }
  0x19   : > { %v216_v4 = vsel %vm215_vm1, %v199_v1, 1.0  ;;  %v217_v5 = vsel %vm215_vm1, %v200_v2, 1.0  ;;  %v202_v6 = vld [vmem:[%s827_s7 + $0x18] sm:$0xff]  ;;  %v218_v7 = vsel %vm215_vm1, %v201_v3, 1.0  ;;  %v203_v12 = vld [vmem:[%s827_s7 + $0x20] sm:$0xff]  ;;  %v204_v13 = vld [vmem:[%s827_s7 + $0x28] sm:$0xff]  ;;  %p679_p11 = scmp.ne.s32.totalorder %s896_s27, %s678_s6 }
  0x1a   : > { %v232_v8 = vpack.c.bf16 %v217_v5, %v216_v4  ;;  %v219_v9 = vsel %vm215_vm1, %v202_v6, 1.0  ;;  %v220_v14 = vsel %vm215_vm1, %v203_v12, 1.0  ;;  %v221_v15 = vsel %vm215_vm1, %v204_v13, 1.0  ;;  %v205_v18 = vld [vmem:[%s827_s7 + $0x30] sm:$0xff]  ;;  %v206_v19 = vld [vmem:[%s827_s7 + $0x38] sm:$0xff]  ;;  %v207_v24 = vld [vmem:[%s827_s7 + $0x40] sm:$0xff] }
  0x1b   : > { %v233_v10 = vpack.c.bf16 %v219_v9, %v218_v7  ;;  %v234_v17 = vpack.c.bf16 %v221_v15, %v220_v14  ;;  %v222_v20 = vsel %vm215_vm1, %v205_v18, 1.0  ;;  %v223_v21 = vsel %vm215_vm1, %v206_v19, 1.0  ;;  %v208_v25 = vld [vmem:[%s827_s7 + $0x48] sm:$0xff]  ;;  %v209_v30 = vld [vmem:[%s827_s7 + $0x50] sm:$0xff]  ;;  %v210_v31 = vld [vmem:[%s827_s7 + $0x58] sm:$0xff]  ;;  %p680_p12 = pnand %p679_p11, %p809_p5 }
  0x1c   : > { %621 = vmatprep.subr.msk.bf16.mxu0 %vm254_vm0, %v232_v8  ;;  %v262_v11 = vsel %vm254_vm0, %v232_v8, 0  ;;  %v235_v23 = vpack.c.bf16 %v223_v21, %v222_v20  ;;  %v224_v26 = vsel %vm215_vm1, %v207_v24, 1.0  ;;  %v225_v27 = vsel %vm215_vm1, %v208_v25, 1.0  ;;  %v211_v36 = vld [vmem:[%s827_s7 + $0x60] sm:$0xff]  ;;  %v212_v37 = vld [vmem:[%s827_s7 + $0x68] sm:$0xff]  ;;  %v213_v42 = vld [vmem:[%s827_s7 + $0x70] sm:$0xff] }
  0x1d   : > { %584 = vmatpush3.bf16.xpose.msra.mxu0 %v262_v11  ;;  %v265_v16 = vsel %vm254_vm0, %v233_v10, 0  ;;  %v268_v22 = vsel %vm254_vm0, %v234_v17, 0  ;;  %v236_v29 = vpack.c.bf16 %v225_v27, %v224_v26  ;;  %v226_v32 = vsel %vm215_vm1, %v209_v30, 1.0  ;;  %v214_v43 = vld [vmem:[%s827_s7 + $0x78] sm:$0xff]  ;;  %v402_v8 = vld [vmem:[%s939_s3] sm:$0x3]  ;;  %p681_p13 = pneg %p680_p12 }
  0x1e   : > { %622 = vmatprep.subr.msk.bf16.mxu0 %vm254_vm0, %v233_v10  ;;  %v271_v28 = vsel %vm254_vm0, %v235_v23, 0  ;;  %v227_v33 = vsel %vm215_vm1, %v210_v31, 1.0  ;;  %v228_v38 = vsel %vm215_vm1, %v211_v36, 1.0  ;;  %v229_v39 = vsel %vm215_vm1, %v212_v37, 1.0  ;;  %s682_s7 = sshll.u32 %s745_s19, 4  ;;  %s683_s7 = int_to_ptr.vmem [resolvable:$false] %s682_s7 }
  0x1f   : > { %v274_v34 = vsel %vm254_vm0, %v236_v29, 0  ;;  %v237_v35 = vpack.c.bf16 %v227_v33, %v226_v32  ;;  %v238_v41 = vpack.c.bf16 %v229_v39, %v228_v38  ;;  %v230_v44 = vsel %vm215_vm1, %v213_v42, 1.0  ;;  %s684_s8 = scalar_lea.vmem %s683_s7, 128  ;;  %p685_p0 = scmp.lt.s32.totalorder %s896_s27, %s683_s7 }
  0x20   : > { %v231_v45 = vsel %vm215_vm1, %v214_v43, 1.0  ;;  %v454_v9 = vlaneseq  ;;  %p686_p1 = scmp.lt.s32.totalorder %s684_s8, %s678_s6 }
  0x21   : > { %v277_v40 = vsel %vm254_vm0, %v237_v35, 0  ;;  %v280_v46 = vsel %vm254_vm0, %v238_v41, 0  ;;  %v239_v47 = vpack.c.bf16 %v231_v45, %v230_v44 }
  0x22   : > { %v455_v10 = vshrl.u32 %v454_v9, 7  ;;  %p687_p2 = por %p686_p1, %p685_p0 }
  0x23   : > { %v283_v48 = vsel %vm254_vm0, %v239_v47, 0 }
  0x24   : > { %p688_p3 = pnand %p687_p2, %p681_p13 }
  0x25   : > { %586 = vmatpush3.bf16.xpose.msra.mxu0 %v265_v16 }
  0x26   : > { %623 = vmatprep.subr.msk.bf16.mxu0 %vm254_vm0, %v234_v17  ;;  %v456_v17 = vsub.s32 0, %v455_v10 }
  0x2d   : > { %588 = vmatpush3.bf16.xpose.msra.mxu0 %v268_v22 }
  0x2e   : > { %624 = vmatprep.subr.msk.bf16.mxu0 %vm254_vm0, %v235_v23 }
  0x35   : > { %590 = vmatpush3.bf16.xpose.msra.mxu0 %v271_v28 }
  0x36   : > { %625 = vmatprep.subr.msk.bf16.mxu0 %vm254_vm0, %v236_v29 }
  0x3d   : > { %592 = vmatpush3.bf16.xpose.msra.mxu0 %v274_v34 }
  0x3e   : > { %626 = vmatprep.subr.msk.bf16.mxu0 %vm254_vm0, %v237_v35 }
  0x45   : > { %594 = vmatpush3.bf16.xpose.msra.mxu0 %v277_v40 }
  0x46   : > { %627 = vmatprep.subr.msk.bf16.mxu0 %vm254_vm0, %v238_v41 }
  0x4d   : > { %596 = vmatpush3.bf16.xpose.msra.mxu0 %v280_v46 }
  0x4e   : > { %628 = vmatprep.subr.msk.bf16.mxu0 %vm254_vm0, %v239_v47 }
  0x55   : > { %598 = vmatpush3.bf16.xpose.msra.mxu0 %v283_v48 }
  0x5c   : > { %600 = vmatmul.mubr.msk.bf16.vlgmr.msra.gmra.mrb[0].mxu0 %vm254_vm0, %v672_v49 }
 0x12f   : > { %v601_v51 = vpop.f32.mrb[0].mxu0 }
 0x130   : > { %v319_v52 = vpop.f32.mrb[1].mxu0  ;;  %v336_v54 = vmax.f32 %v601_v51, 0.0 }
 0x131   : > { %v602_v53 = vpop.f32.mrb[2].mxu0  ;;  %v334_v57 = vmax.f32 %v319_v52, 0.0 }
 0x132   : > { %v337_v55 = vmax.f32 %v602_v53, 0.0  ;;  %v322_v56 = vpop.f32.mrb[3].mxu0 }
 0x133   : > { %v335_v58 = vmax.f32 %v322_v56, 0.0 }
 0x134   : > { %v339_v59 = vpack.c.bf16 %v337_v55, %v336_v54 }
 0x135   : > { %v338_v60 = vpack.c.bf16 %v335_v58, %v334_v57 }
 0x137   : > { %604 = vmatpush3.bf16.msra.mxu1 %v338_v60 }
 0x138   : > { %605 = vmatprep.subr.bf16.mxu1 %v742_v50 }
 0x13b   : > { %606 = vmatpush3.bf16.msra.mxu1 %v339_v59 }
 0x13c   : > { %607 = vmatprep.subr.bf16.mxu1 %v742_v50 }
 0x13f   : > { %608 = vmatpush3.bf16.msra.mxu1 %v356_v63 }
 0x140   : > { %613 = vmatprep.subr.bf16.mxu1 %v742_v50 }
 0x142   : > { %610 = vmatmul.mubr.msk.bf16.vlgmr.msra.gmra.mrb[0].mxu1 %vm348_vm4, %v673_v0 }
 0x143   : > { %617 = vmatprep.mubr.msk.bf16.mxu1 %vm743_vm2, %v742_v50 }
 0x215   : > { %v392_v1 = vpop.f32.mrb[0].mxu1 }
 0x216   : > { %v611_v2 = vpop.f32.mrb[1].mxu1  ;;  %v399_v4 = vmax.f32 %v392_v1, 0.0 }
 0x217   : > { %v395_v3 = vpop.f32.mrb[2].mxu1 }
 0x218   : > { %v400_v5 = vmax.f32 %v395_v3, 0.0  ;;  %v612_v6 = vpop.f32.mrb[3].mxu1 }
 0x21a   : > { %v401_v7 = vpack.c.bf16 %v400_v5, %v399_v4 }
 0x21c   : > { %614 = vmatpush3.bf16.msra.mxu1 %v401_v7 }
 0x21d   : > { %615 = vmatprep.subr.bf16.mxu1 %v742_v50 }
 0x220   : > { %616 = vmatpush3.bf16.msra.mxu1 %v356_v63 }
 0x223   : > { %618 = vmatmul.mubr.msk.bf16.vlgmr.msra.gmra.mrb[4].mxu1 %vm403_vm5, %v402_v8 }
 0x2f6   : > { %v441_v11 = vpop.f32.mrb[4].mxu1 }
 0x2f7   : > { %v448_v12 = vrot.slane %v441_v11, 1  ;;  %v619_v13 = vpop.f32.mrb[5].mxu1  ;;  %v451_v16 = vrot.slane %v441_v11, 2 }
 0x2f8   : > { %v444_v14 = vpop.f32.mrb[6].mxu1 }
 0x2f9   : > { %v450_v15 = vmax.f32 %v441_v11, %v448_v12  ;;  %v620_v18 = vpop.f32.mrb[7].mxu1 }
 0x2fb   : > { %v453_v19 = vmax.f32 %v450_v15, %v451_v16 }
 0x2fd   : > { %v457_v20 = vrot.slane %v453_v19, %v456_v17 }
 0x2ff   : > { %v458_v21 = vsub.f32 %v441_v11, %v457_v20 }
 0x301   : > { %v459_v22 = vmul.f32 1.442695, %v458_v21 }
 0x303   : > { %674 = vpow2.f32 %v459_v22 }
 0x30d   : > { %v675_v23 = vpop.eup %674 }
 0x30e   : > { %v462_v24 = vrot.slane %v675_v23, 1  ;;  %v465_v26 = vrot.slane %v675_v23, 2 }
 0x310   : > { %v464_v25 = vadd.f32 %v675_v23, %v462_v24 }
 0x312   : > { %v467_v27 = vadd.f32 %v465_v26, %v464_v25 }
 0x314   : > { %676 = vrcp.f32 %v467_v27 }
 0x31e   : > { %v677_v28 = vpop.eup %676 }
 0x31f   : > { %v472_v29 = vrot.slane %v677_v28, %v456_v17 }
 0x321   : > { %v473_v30 = vmul.f32 %v675_v23, %v472_v29 }
 0x323   : > { %474 = vst [vmem:[%s191_s23] sm:$0x7] %v473_v30 }
 0x324   : > { %691 = shalt.err (!%p688_p3)
}
 0x325   : > { %s692_s9 = scalar_lea.hbm %s894_s30, 64  ;;  %s696_s12 = scalar_lea.hbm %s940_s4, 128 }
 0x326   : > { %p693_p4 = scmp.ne.s32.totalorder %s894_s30, %s692_s9  ;;  %p697_p9 = scmp.lt.u32.totalorder %s894_s30, %s940_s4 }
 0x327   : > { %p698_p10 = scmp.lt.u32.totalorder %s696_s12, %s692_s9  ;;  %p700_p12 = scmp.lt.u32.totalorder %s692_s9, %s894_s30 }
 0x328   : > { %p694_p7 = pnand %p693_p4, %p809_p5 }
 0x329   : > { %p699_p11 = por %p698_p10, %p697_p9 }
 0x32a   : > { %p695_p8 = pneg %p694_p7 }
 0x32b   : > { %p701_p13 = por %p700_p12, %p699_p11 }
 0x32d   : > { %p702_p0 = pnand %p701_p13, %p695_p8 }
 0x32f   : > { %705 = shalt.err (!%p702_p0)
}
 0x330   : > { %629 = dma.vmem_to_hbm [thread:$0]  (%p809_p5), %s896_s27, 64, %s894_s30, %s476_s5  }
 0x331 PF: > { %p635_p1 = scmp.ge.s32.totalorder %s740_s18, 2  ;;  %s501_s20 = sand.u32 1, %s728_s15  }
 0x332   : > { %s502_s22 = scalar_lea.sflag [#allocation3], %s501_s20 }
 0x333   : > { %p632_p2 = pnand %p635_p1, %p813_p6 }
 0x335   : > { %723 = dma.done.wait (!%p632_p2), %s502_s22, 64  }
 0x336   : > { %725 = vsyncadd (!%p632_p2), %s502_s22, 4294967232  ;;  %p14_p3 = scmp.ge.s32.totalorder %s796_s21, 4   ;;  %s943_s15 = smov %s732_s16 }
 0x337   : > { %s944_s16 = smov %s736_s17  ;;  %s945_s17 = smov %s807_s24 }
 0x338   : > { %s946_s18 = smov %s796_s21  ;;  %16 = sbr.rel (!%p14_p3) target bundleno = 3 (0x3), region = 71 }
 0x33f   :  { %507 = vsyncpa [#allocation3], 1 }
 0x340   :  { %509 = vsyncpa [#allocation3 + $0x1], 1 }

</bundles_post_ra>
